<compile_context>
chip_gen: v7x
topology: tpu7x:2x2x1
jax: 0.10.0
libtpu: 0.0.40
codegen_flags: <defaults>
</compile_context>

<pallas_src>
import functools
import math

import jax
import jax.numpy as jnp
from jax.experimental import pallas as pl
from jax.experimental.pallas import tpu as pltpu


def _round_up(x, m):
    return ((x + m - 1) // m) * m


def _vmem_budget():
    """Per-generation (tile_budget_bytes, vmem_limit_bytes)."""
    try:
        cap = int(pltpu.get_tpu_info().vmem_capacity_bytes)
    except Exception:
        cap = 64 * 1024 * 1024  # conservative (v7x-sized) fallback
    limit = min((cap * 3) // 4, 96 * 1024 * 1024)   # 48 MiB on v7x, 96 MiB on v5e/v6e
    budget = min((cap * 3) // 8, 48 * 1024 * 1024)  # 24 MiB on v7x, 48 MiB on v5e/v6e
    return budget, limit


def _normalize_slice(dim_size, start, end, step):
    """Static normalization of the slice parameters (torch semantics, step > 0)."""
    if step is None:
        step = 1
    assert step > 0, "slice_scatter requires a positive step"
    if start is None:
        start = 0
    elif start < 0:
        start += dim_size
    if end is None:
        end = dim_size
    elif end < 0:
        end += dim_size
    start = max(0, min(start, dim_size))
    end = max(start, min(end, dim_size))
    n = max(0, -(-(end - start) // step))  # ceil_div -> number of scattered rows
    return start, end, step, n


# ---------------------------------------------------------------------------
# In-place contiguous scatter (step == 1): src streamed through VMEM, DMA'd
# onto the aliased HBM output.  Only the scattered bytes are touched.
# ---------------------------------------------------------------------------

def _inplace_scatter_kernel(x_hbm, src_ref, out_hbm, sem, *, offset, bB, bL, B, L):
    """src_ref: (bB, bL) VMEM block of src.  out_hbm: (B, M) HBM ref aliased to
    the input (so it already holds the original values); DMA the valid part of
    the src block onto out_hbm[b*bB : , offset + l*bL : ]."""
    del x_hbm  # same HBM buffer as out_hbm
    b = pl.program_id(0)
    l = pl.program_id(1)
    nb = pl.num_programs(0)
    nl = pl.num_programs(1)
    last_rows = B - (nb - 1) * bB
    last_cols = L - (nl - 1) * bL

    def copy(rows, cols):
        if rows == bB and cols == bL:
            src = src_ref
        else:
            src = src_ref.at[pl.ds(0, rows), pl.ds(0, cols)]
        dst = out_hbm.at[pl.ds(b * bB, rows), pl.ds(offset + l * bL, cols)]
        cp = pltpu.make_async_copy(src, dst, sem)
        cp.start()
        cp.wait()

    row_edge = (B % bB) != 0
    col_edge = (L % bL) != 0

    if not row_edge and not col_edge:
        copy(bB, bL)
    elif row_edge and not col_edge:
        @pl.when(b < nb - 1)
        def _():
            copy(bB, bL)

        @pl.when(b == nb - 1)
        def _():
            copy(last_rows, bL)
    elif col_edge and not row_edge:
        @pl.when(l < nl - 1)
        def _():
            copy(bB, bL)

        @pl.when(l == nl - 1)
        def _():
            copy(bB, last_cols)
    else:
        @pl.when(jnp.logical_and(b < nb - 1, l < nl - 1))
        def _():
            copy(bB, bL)

        @pl.when(jnp.logical_and(b < nb - 1, l == nl - 1))
        def _():
            copy(bB, last_cols)

        @pl.when(jnp.logical_and(b == nb - 1, l < nl - 1))
        def _():
            copy(last_rows, bL)

        @pl.when(jnp.logical_and(b == nb - 1, l == nl - 1))
        def _():
            copy(last_rows, last_cols)


def _inplace_call(x2, s2, offset):
    """x2: (B, M) aliased in/out; s2: (B, L); write s2 into x2[:, offset:offset+L]."""
    B, M = x2.shape
    _, L = s2.shape
    itemsize = jnp.dtype(x2.dtype).itemsize
    budget, limit = _vmem_budget()
    pack = 8 * max(1, 4 // itemsize)                     # 8 f32 / 16 bf16 / 32 int8
    elems = max(budget // (2 * itemsize), 128 * pack)    # src is double-buffered

    # Lane (column) tile: full L, or a multiple of 128.
    min_rows = max(min(B, pack), 1)
    max_bL = max(elems // min_rows, 128)
    bL = L if L <= max_bL else max(128, (max_bL // 128) * 128)
    # Row tile: full B, or a multiple of the sublane pack.
    max_bB = max(elems // bL, 1)
    bB = B if B <= max_bB else min(B, max(pack, (max_bB // pack) * pack))

    # Give v7x's second TensorCore something to do.
    if pl.cdiv(B, bB) * pl.cdiv(L, bL) == 1:
        if B >= 2 * pack:
            bB = min(B, max(pack, _round_up(pl.cdiv(B, 2), pack)))
        elif L >= 256:
            bL = min(L, max(128, _round_up(pl.cdiv(L, 2), 128)))

    grid = (pl.cdiv(B, bB), pl.cdiv(L, bL))
    kernel = functools.partial(_inplace_scatter_kernel, offset=offset,
                               bB=bB, bL=bL, B=B, L=L)
    return pl.pallas_call(
        kernel,
        out_shape=jax.ShapeDtypeStruct((B, M), x2.dtype),
        grid=grid,
        in_specs=[
            pl.BlockSpec(memory_space=pl.ANY),               # aliased input, stays in HBM
            pl.BlockSpec((bB, bL), lambda b, l: (b, l)),     # src streamed through VMEM
        ],
        out_specs=pl.BlockSpec(memory_space=pl.ANY),
        scratch_shapes=[pltpu.SemaphoreType.DMA],
        input_output_aliases={0: 0},
        compiler_params=pltpu.CompilerParams(
            dimension_semantics=("parallel", "parallel"),
            vmem_limit_bytes=limit,
        ),
    )(x2, s2)


# ---------------------------------------------------------------------------
# Strided scatter (step > 1, rare): full copy + one strided sublane store.
# ---------------------------------------------------------------------------

def _strided_rows_kernel(in_ref, src_ref, out_ref, *, start, step, n):
    """in/out: (D, bR); src: (n, bR).  Scatter along the sublane axis."""
    out_ref[...] = in_ref[...]
    out_ref[pl.ds(start, n, stride=step), :] = src_ref[...]


def _strided_rows_call(x3, s3, start, step, n):
    """x3: (B, D, R), s3: (B, n, R).  Scatter dim D is on the sublane axis."""
    B, D, R = x3.shape
    itemsize = jnp.dtype(x3.dtype).itemsize
    budget, limit = _vmem_budget()
    per_lane = (2 * D + n) * itemsize * 2                 # in + out + src, double-buffered
    max_lanes = max(budget // per_lane, 128)
    if R <= max_lanes:
        bR = R                                            # full trailing extent (lane-dense)
    else:
        bR = int(max(128, min((max_lanes // 128) * 128, 8192)))
    if B == 1 and pl.cdiv(R, bR) == 1 and R >= 256:       # >=2 steps for the v7x megacore
        bR = min(R, max(128, _round_up(pl.cdiv(R, 2), 128)))
    grid = (B, pl.cdiv(R, bR))
    kernel = functools.partial(_strided_rows_kernel, start=start, step=step, n=n)
    return pl.pallas_call(
        kernel,
        out_shape=jax.ShapeDtypeStruct((B, D, R), x3.dtype),
        grid=grid,
        in_specs=[
            pl.BlockSpec((None, D, bR), lambda b, r: (b, 0, r)),
            pl.BlockSpec((None, n, bR), lambda b, r: (b, 0, r)),
        ],
        out_specs=pl.BlockSpec((None, D, bR), lambda b, r: (b, 0, r)),
        compiler_params=pltpu.CompilerParams(
            dimension_semantics=("parallel", "parallel"),
            vmem_limit_bytes=limit,
        ),
    )(x3, s3)


# ---------------------------------------------------------------------------
# Public API
# ---------------------------------------------------------------------------

def slice_scatter(input, src, dim=0, start=None, end=None, step=1):
    input = jnp.asarray(input)
    src = jnp.asarray(src)
    if src.dtype != input.dtype:
        src = src.astype(input.dtype)
    ndim = input.ndim
    if ndim == 0:
        raise ValueError("slice_scatter requires at least a 1-D input")
    d = dim % ndim
    D = input.shape[d]
    start_, _end, step_, n = _normalize_slice(D, start, end, step)

    expected = list(input.shape)
    expected[d] = n
    if tuple(src.shape) != tuple(expected):
        raise ValueError(
            f"src shape {tuple(src.shape)} does not match slice shape "
            f"{tuple(expected)} (dim={d}, start={start}, end={end}, step={step})")

    if n == 0 or src.size == 0:
        return input
    if step_ == 1 and n == D:
        return src  # full replacement along `dim`

    if step_ == 1:
        # Flatten the scatter dim together with everything after it: the
        # scattered region becomes one contiguous [offset, offset+L) lane range
        # per leading row -> in-place, region-restricted, lane-dense DMAs.
        lead = int(math.prod(input.shape[:d]))
        rest = int(math.prod(input.shape[d + 1:]))
        M = D * rest
        out2 = _inplace_call(input.reshape(lead, M),
                             src.reshape(lead, n * rest),
                             start_ * rest)
        return out2.reshape(input.shape)

    if d < ndim - 1:
        # Strided scatter along a non-innermost dim: scatter dim on sublanes.
        lead = input.shape[:d]
        restd = input.shape[d + 1:]
        B = int(math.prod(lead))
        R = int(math.prod(restd))
        out3 = _strided_rows_call(input.reshape(B, D, R), src.reshape(B, n, R),
                                  start_, step_, n)
        return out3.reshape(input.shape)

    # Rare: strided scatter along the innermost axis.
    if ndim == 1:
        out3 = _strided_rows_call(input.reshape(1, D, 1), src.reshape(1, n, 1),
                                  start_, step_, n)
        return out3.reshape(input.shape)
    x_t = jnp.moveaxis(input, d, 0)
    s_t = jnp.moveaxis(src, d, 0)
    R = int(math.prod(x_t.shape[1:]))
    out3 = _strided_rows_call(x_t.reshape(1, D, R), s_t.reshape(1, n, R),
                              start_, step_, n)
    return jnp.moveaxis(out3.reshape(x_t.shape), 0, d)


class SliceScatter:
    """JAX/Pallas equivalent of the PyTorch SliceScatter nn.Module."""

    def __init__(self, dim=0, start=None, end=None, step=1):
        self.dim = dim
        self.start = start
        self.end = end
        self.step = step

    def __call__(self, input, src):
        return slice_scatter(input, src, self.dim, self.start, self.end, self.step)


if __name__ == "__main__":
    key = jax.random.PRNGKey(0)
    ks = jax.random.split(key, 10)

    x = jax.random.normal(ks[0], (2, 4, 16, 16), dtype=jnp.float32)

    # 1) strided scatter along a middle (sublane) dim: H = 2:14:3 -> rows 2,5,8,11
    src1 = jax.random.normal(ks[1], (2, 4, 4, 16), dtype=jnp.float32)
    out1 = jax.block_until_ready(SliceScatter(dim=2, start=2, end=14, step=3)(x, src1))
    assert out1.shape == x.shape and out1.dtype == x.dtype
    assert jnp.array_equal(out1, x.at[:, :, 2:14:3, :].set(src1)), "dim=2 step=3 mismatch"

    # 2) contiguous scatter along the channel dim (in-place path)
    src2 = jax.random.normal(ks[2], (2, 3, 16, 16), dtype=jnp.float32)
    out2 = jax.block_until_ready(SliceScatter(dim=1, start=1)(x, src2))
    assert jnp.array_equal(out2, x.at[:, 1:, :, :].set(src2)), "dim=1 mismatch"

    # 3) contiguous scatter along the innermost (lane) dim (in-place path)
    src3 = jax.random.normal(ks[3], (2, 4, 16, 8), dtype=jnp.float32)
    out3 = jax.block_until_ready(SliceScatter(dim=-1, start=4, end=12)(x, src3))
    assert jnp.array_equal(out3, x.at[:, :, :, 4:12].set(src3)), "dim=-1 mismatch"

    # 4) strided scatter along the innermost dim (fallback path)
    src4 = jax.random.normal(ks[4], (2, 4, 16, 6), dtype=jnp.float32)
    out4 = jax.block_until_ready(SliceScatter(dim=-1, start=1, end=13, step=2)(x, src4))
    assert jnp.array_equal(out4, x.at[:, :, :, 1:13:2].set(src4)), "dim=-1 step=2 mismatch"

    # 5) leading-dim contiguous scatter (in-place path, B == 1 view)
    src5 = jax.random.normal(ks[5], (1, 4, 16, 16), dtype=jnp.float32)
    out5 = jax.block_until_ready(SliceScatter(dim=0, start=1, end=2)(x, src5))
    assert jnp.array_equal(out5, x.at[1:2].set(src5)), "dim=0 mismatch"

    # 6) bf16 (sub-32-bit sublane packing), contiguous scatter (in-place path)
    xb = x.astype(jnp.bfloat16)
    src6 = jax.random.normal(ks[6], (2, 2, 16, 16), dtype=jnp.float32).astype(jnp.bfloat16)
    out6 = jax.block_until_ready(SliceScatter(dim=1, start=2, end=4)(xb, src6))
    assert out6.dtype == jnp.bfloat16
    assert jnp.array_equal(out6, xb.at[:, 2:4, :, :].set(src6)), "bf16 mismatch"

    # 7) 1-D contiguous scatter (in-place path, single row)
    x7 = jax.random.normal(ks[7], (300,), dtype=jnp.float32)
    src7 = jax.random.normal(ks[8], (200,), dtype=jnp.float32)
    out7 = jax.block_until_ready(SliceScatter(dim=0, start=5, end=205)(x7, src7))
    assert jnp.array_equal(out7, x7.at[5:205].set(src7)), "1-D mismatch"

    print("KERNEL_OK")
</pallas_src>

<mosaic_0001>
module attributes {stable_mosaic.version = 11 : i64} {
  func.func @_strided_rows_kernel(%arg0: i32, %arg1: i32, %arg2: memref<1x16x16xf32, #tpu.memory_space<vmem>>, %arg3: memref<1x4x16xf32, #tpu.memory_space<vmem>>, %arg4: memref<1x16x16xf32, #tpu.memory_space<vmem>>) attributes {dimension_semantics = [#tpu.dimension_semantics<parallel>, #tpu.dimension_semantics<parallel>], iteration_bounds = array<i64: 8, 1>, scalar_prefetch = 0 : i64, scratch_operands = 0 : i64, tpu.core_type = #tpu.core_type<tc>, window_params = [{transform_indices = @transform_0, window_bounds = array<i64: 1, 16, 16>}, {transform_indices = @transform_1, window_bounds = array<i64: 1, 4, 16>}, {transform_indices = @transform_2, window_bounds = array<i64: 1, 16, 16>}]} {
    %c0 = arith.constant 0 : index
    %c0_0 = arith.constant 0 : index
    %c0_1 = arith.constant 0 : index
    %0 = vector.load %arg2[%c0, %c0_0, %c0_1] : memref<1x16x16xf32, #tpu.memory_space<vmem>>, vector<1x16x16xf32>
    %1 = vector.shape_cast %0 : vector<1x16x16xf32> to vector<16x16xf32>
    %c0_2 = arith.constant 0 : index
    %c0_3 = arith.constant 0 : index
    %c0_4 = arith.constant 0 : index
    %2 = vector.load %arg4[%c0_2, %c0_3, %c0_4] : memref<1x16x16xf32, #tpu.memory_space<vmem>>, vector<1x16x16xf32>
    %3 = vector.shape_cast %2 : vector<1x16x16xf32> to vector<16x16xf32>
    %4 = vector.shape_cast %1 : vector<16x16xf32> to vector<1x16x16xf32>
    tpu.vector_store %arg4[%c0_2, %c0_3, %c0_4], %4 {strides = array<i32>} : memref<1x16x16xf32, #tpu.memory_space<vmem>>, vector<1x16x16xf32>,
    %c0_5 = arith.constant 0 : index
    %c0_6 = arith.constant 0 : index
    %c0_7 = arith.constant 0 : index
    %5 = vector.load %arg3[%c0_5, %c0_6, %c0_7] : memref<1x4x16xf32, #tpu.memory_space<vmem>>, vector<1x4x16xf32>
    %6 = vector.shape_cast %5 : vector<1x4x16xf32> to vector<4x16xf32>
    %c0_8 = arith.constant 0 : index
    %c2 = arith.constant 2 : index
    %c0_9 = arith.constant 0 : index
    %7 = tpu.strided_load %arg4[%c0_8, %c2, %c0_9] {strides = array<i32: 1, 3, 1>} : memref<1x16x16xf32, #tpu.memory_space<vmem>>, vector<1x4x16xf32>
    %8 = vector.shape_cast %7 : vector<1x4x16xf32> to vector<4x16xf32>
    %9 = vector.shape_cast %6 : vector<4x16xf32> to vector<1x4x16xf32>
    tpu.strided_store %arg4[%c0_8, %c2, %c0_9], %9 {strides = array<i32: 1, 3, 1>} : memref<1x16x16xf32, #tpu.memory_space<vmem>>, vector<1x4x16xf32>
    return
  }
  func.func @transform_0(%arg0: i32, %arg1: i32) -> (i32, i32, i32) {
    %c0_i32 = arith.constant 0 : i32
    %c0_i32_0 = arith.constant 0 : i32
    return %arg0, %c0_i32, %arg1 : i32, i32, i32
  }
  func.func @transform_1(%arg0: i32, %arg1: i32) -> (i32, i32, i32) {
    %c0_i32 = arith.constant 0 : i32
    %c0_i32_0 = arith.constant 0 : i32
    return %arg0, %c0_i32, %arg1 : i32, i32, i32
  }
  func.func @transform_2(%arg0: i32, %arg1: i32) -> (i32, i32, i32) {
    %c0_i32 = arith.constant 0 : i32
    %c0_i32_0 = arith.constant 0 : i32
    return %arg0, %c0_i32, %arg1 : i32, i32, i32
  }
}

</mosaic_0001>

<bundles_post_ra>
// kernel: tpu_custom_call.1
= control target key start
LH: loop header
LB: loop body
LE: loop exit
PB: predicated region body
PF: predicated region fallthrough
CT: control target
= control target key end

     0   :  { %7 = vsyncpa [#allocation3], 0  ;;  %s828_s0 = inlined_call_operand.hbm [shape: f32[8,16,16], index: 0, kind: input, shape index: {}]   ;;  %s829_s1 = inlined_call_operand.hbm [shape: f32[8,4,16], index: 1, kind: input, shape index: {}]   ;;  %s830_s2 = inlined_call_operand.hbm [shape: f32[8,16,16], index: 2, kind: output, shape index: {}]  }
   0x1   :  { %9 = vsyncpa [#allocation3 + $0x1], 0 }
   0x2   :  { %10 = vsyncpa [#allocation6], 0 }
   0x3   :  { %12 = vsyncpa [#allocation6 + $0x1], 0 }
   0x4   :  { %13 = vsyncpa [#allocation4], 0 }
   0x5   :  { %15 = vsyncpa [#allocation4 + $0x1], 0  ;;  %s613_s9 = smov 0   ;;  %s615_s10 = smov 0  }
   0x6   :  { %s617_s11 = smov 0   ;;  %s619_s12 = smov 0  }
   0x7   :  { %s621_s13 = smov 0   ;;  %s623_s14 = smov 0  }
   0x8 LB: > { %s351_s15 = sadd.s32 4294967295, %s589_s14   ;;  %s352_s16 = sadd.s32 4294967294, %s589_s14   ;;  %s589_s14 = sphi %s623_s14, %s21_s14   ;;  %s585_s13 = sphi %s621_s13, %s848_s13   ;;  %s581_s12 = sphi %s619_s12, %s847_s12   ;;  %s577_s11 = sphi %s617_s11, %s846_s11   ;;  %s573_s10 = sphi %s615_s10, %s845_s10   ;;  %s569_s9 = sphi %s613_s9, %s844_s9  }
   0x9   : > { %s33_s17 = sadd.s32 1, %s585_s13  ;;  %s42_s18 = sadd.s32 1, %s577_s11 }
   0xa   : > { %p35_p0 = scmp.ge.s32.totalorder %s33_s17, 8  ;;  %p49_p1 = scmp.ne.s32.totalorder %s577_s11, %s573_s10 }
   0xb   : > { %p50_p2 = scmp.eq.s32.totalorder %s589_s14, 0  ;;  %p55_p3 = scmp.ne.s32.totalorder %s573_s10, %s569_s9 }
   0xc   : > { %s850_s17 = smov (%p35_p0, %s33_s17), 0  ;;  %p56_p5 = scmp.eq.s32.totalorder %s351_s15, 0 }
   0xd   : > { %p654_p4 = por %p50_p2, %p49_p1  ;;  %s37_s20 = ssub.s32 %s585_s13, %s850_s17 }
   0xe   : > { %p109_p6 = scmp.eq.s32.totalorder %s351_s15, 7  ;;  %p40_p7 = scmp.eq.s32.totalorder %s37_s20, 0 }
   0xf   : > { %p660_p8 = por %p56_p5, %p55_p3  ;;  %p115_p10 = scmp.eq.s32.totalorder %s352_s16, 7 }
  0x10   : > { %p664_p9 = por %p109_p6, %p49_p1  ;;  %p389_p12 = scmp.lt.s32.totalorder %s589_s14, 8 }
  0x11   : > { %s834_s21 = scalar_select %p660_p8, 1, 0 }
  0x12   : > { %s835_s22 = scalar_select %p664_p9, 1, 0 }
  0x13   : > { %s669_s23 = scalar_select %p40_p7, %s577_s11, %s42_s18  }
  0x14   : > { %p671_p11 = por %p115_p10, %p55_p3  ;;  %s677_s25 = sand.u32 1, %s577_s11  }
  0x15   : > { %s355_s26 = sshll.u32 %s677_s25, 4  ;;  %s370_s27 = sshll.u32 %s585_s13, 8 }
  0x16   : > { %s836_s24 = scalar_select %p671_p11, 1, 0 }
  0x17   : > { %s684_s30 = scalar_lea.hbm %s828_s0, %s370_s27  ;;  %s139_s3 = scalar_lea.vmem [#allocation2], %s355_s26 }
  0x18   : > { %s147_s4 = sshll.u32 %s139_s3, 4  ;;  %p690_p13 = pnand %p389_p12, %p654_p4  ;;  %s686_s4 = int_to_ptr.vmem [resolvable:$true] %s147_s4 }
  0x19   : > { %s136_s6 = scalar_lea.sflag [#allocation3], %s677_s25  ;;  %s443_s7 = scalar_lea.hbm %s684_s30, 256 }
  0x1a   : > { %p444_p1 = scmp.ne.s32.totalorder %s684_s30, %s443_s7  ;;  %p445_p2 = pneg %p690_p13 }
  0x1b   : > { %s448_s16 = scalar_lea.hbm %s828_s0, 2048  ;;  %p449_p4 = scmp.lt.u32.totalorder %s684_s30, %s828_s0 }
  0x1c   : > { %p446_p3 = pnand %p445_p2, %p444_p1  ;;  %p450_p6 = scmp.lt.u32.totalorder %s448_s16, %s443_s7 }
  0x1d   : > { %p452_p10 = scmp.lt.u32.totalorder %s443_s7, %s684_s30 }
  0x1e   : > { %p447_p5 = pneg %p446_p3  ;;  %p451_p7 = por %p450_p6, %p449_p4 }
  0x20   : > { %p453_p12 = por %p452_p10, %p451_p7 }
  0x22   : > { %p454_p0 = pnand %p453_p12, %p447_p5 }
  0x24   : > { %457 = shalt.err (!%p454_p0)
}
  0x25   : > { %s458_s20 = scalar_lea.vmem %s686_s4, 256  ;;  %s591_s26 = smov [#allocation2]  }
  0x26   : > { %p459_p1 = scmp.ne.s32.totalorder %s686_s4, %s458_s20  ;;  %s463_s27 = sshll.u32 %s591_s26, 4  ;;  %s464_s27 = int_to_ptr.vmem [resolvable:$false] %s463_s27 }
  0x27   : > { %s465_s28 = scalar_lea.vmem %s464_s27, 512  ;;  %p466_p9 = scmp.lt.s32.totalorder %s686_s4, %s464_s27 }
  0x28   : > { %p461_p3 = pnand %p459_p1, %p445_p2  ;;  %p467_p4 = scmp.lt.s32.totalorder %s465_s28, %s458_s20 }
  0x2a   : > { %p462_p11 = pneg %p461_p3  ;;  %p468_p6 = por %p467_p4, %p466_p9 }
  0x2c   : > { %p469_p7 = pnand %p468_p6, %p462_p11 }
  0x2e   : > { %472 = shalt.err (!%p469_p7)
}
  0x2f   : > { %s592_s29 = smov 128   ;;  %s593_s3 = smov 8  }
  0x30   : > { %381 = dma.hbm_to_vmem [thread:$0]  (!%p690_p13), %s684_s30, 256, %s686_s4, %s136_s6, %s592_s29, %s592_s29, %s593_s3  }
  0x31   : > { %p174_p0 = scmp.lt.s32.totalorder %s589_s14, 9  ;;  %s358_s7 = sshll.u32 %s677_s25, 2 }
  0x32   : > { %s359_s8 = sshll.u32 %s585_s13, 6  ;;  %p838_p9 = scmp.ge.s32.totalorder %s589_s14, 1 }
  0x33   : > { %s735_s19 = scalar_lea.hbm %s829_s1, %s359_s8  ;;  %s161_s20 = scalar_lea.vmem [#allocation5], %s358_s7 }
  0x34   : > { %p728_p11 = pnand %p838_p9, %p174_p0  ;;  %s169_s26 = sshll.u32 %s161_s20, 4  ;;  %s170_s26 = int_to_ptr.vmem [resolvable:$true] %s169_s26 }
  0x35   : > { %s158_s30 = scalar_lea.sflag [#allocation6], %s677_s25  ;;  %s473_s4 = scalar_lea.hbm %s735_s19, 64 }
  0x36   : > { %s839_s15 = scalar_select %p728_p11, 1, 0 }
  0x37   : > { %p474_p5 = scmp.ne.s32.totalorder %s735_s19, %s473_s4  ;;  %s478_s28 = scalar_lea.hbm %s829_s1, 512 }
  0x38   : > { %p479_p1 = scmp.lt.u32.totalorder %s735_s19, %s829_s1  ;;  %p480_p3 = scmp.lt.u32.totalorder %s478_s28, %s473_s4 }
  0x39   : > { %p476_p10 = pnand %p474_p5, %p445_p2  ;;  %p482_p6 = scmp.lt.u32.totalorder %s473_s4, %s735_s19 }
  0x3a   : > { %p481_p4 = por %p480_p3, %p479_p1 }
  0x3b   : > { %p477_p12 = pneg %p476_p10 }
  0x3c   : > { %p483_p7 = por %p482_p6, %p481_p4 }
  0x3e   : > { %p484_p0 = pnand %p483_p7, %p477_p12 }
  0x40   : > { %487 = shalt.err (!%p484_p0)
}
  0x41   : > { %s488_s25 = scalar_lea.vmem %s170_s26, 64  ;;  %s594_s7 = smov [#allocation5]  }
  0x42   : > { %p489_p9 = scmp.ne.s32.totalorder %s170_s26, %s488_s25  ;;  %s493_s8 = sshll.u32 %s594_s7, 4  ;;  %s494_s8 = int_to_ptr.vmem [resolvable:$false] %s493_s8 }
  0x43   : > { %s495_s16 = scalar_lea.vmem %s494_s8, 128  ;;  %p496_p8 = scmp.lt.s32.totalorder %s170_s26, %s494_s8 }
  0x44   : > { %p491_p5 = pnand %p489_p9, %p445_p2  ;;  %p497_p11 = scmp.lt.s32.totalorder %s495_s16, %s488_s25 }
  0x46   : > { %p492_p10 = pneg %p491_p5  ;;  %p498_p1 = por %p497_p11, %p496_p8 }
  0x48   : > { %p499_p3 = pnand %p498_p1, %p492_p10 }
  0x4a   : > { %502 = shalt.err (!%p499_p3)
}
  0x4b   : > { %384 = dma.hbm_to_vmem [thread:$0]  (!%p690_p13), %s735_s19, 64, %s170_s26, %s158_s30  }
  0x4c   : > { %p840_p12 = scmp.ne.s32.totalorder %s839_s15, 0 }
  0x4d   : > { %s760_s18 = sand.u32 (!%p840_p12), 1, %s573_s10   ;;  %p841_p2 = scmp.ne.s32.totalorder (!%p840_p12), %s834_s21, 0 }
  0x4e   : > { %178 = sbr.rel (%p840_p12) target bundleno = 116 (0x74), region = 28  ;;  %s361_s20 = sshll.u32 (!%p840_p12), %s760_s18, 4 }
  0x4f   : > { %s181_s4 = scalar_lea.sflag (!%p840_p12), [#allocation3], %s760_s18  ;;  %s184_s6 = scalar_lea.vmem (!%p840_p12), [#allocation2], %s361_s20 }
  0x55   : > { %556 = dma.done.wait (%p841_p2), %s181_s4, 256  }
  0x56   : > { %558 = vsyncadd (%p841_p2), %s181_s4, 4294967040  ;;  %s362_s5 = sshll.u32 %s760_s18, 2  ;;  %s190_s15 = scalar_lea.sflag [#allocation6], %s760_s18 }
  0x57   : > { %s193_s19 = scalar_lea.vmem [#allocation5], %s362_s5 }
  0x58   : > { %560 = dma.done.wait (%p841_p2), %s190_s15, 64  }
  0x59   : > { %562 = vsyncadd (%p841_p2), %s190_s15, 4294967232  ;;  %s218_s26 = scalar_lea.vmem [#allocation7], %s361_s20  ;;  %s371_s27 = sshll.u32 %s581_s12, 8  ;;  %vm221_vm0 = vcmask 130048   ;;  %v219_v0 = vld [vmem:[%s184_s6] sm:$0xff]  ;;  %v220_v1 = vld [vmem:[%s184_s6 + $0x8] sm:$0xff] }
  0x5a   : > { %s242_s30 = sshll.u32 %s218_s26, 4  ;;  %s780_s3 = scalar_lea.hbm %s830_s2, %s371_s27  ;;  %v224_v2 = vld [vmem:[%s193_s19] sm:$0xf]  ;;  %222 = vst.msk [vmem:[%s218_s26] sm:$0xff] %vm221_vm0, %v219_v0  ;;  %223 = vst.msk [vmem:[%s218_s26 + $0x8] sm:$0xff] %vm221_vm0, %v220_v1  ;;  %s775_s30 = int_to_ptr.vmem [resolvable:$true] %s242_s30 }
  0x5b   : > { %364 = vst [vmem:[%s218_s26 + $0x2] ss:$3 sm:$0xf] %v224_v2  ;;  %s228_s21 = scalar_lea.sflag [#allocation4], %s760_s18  ;;  %s503_s25 = scalar_lea.vmem %s775_s30, 256 }
  0x5c   : > { %p504_p8 = scmp.ne.s32.totalorder %s775_s30, %s503_s25  ;;  %p842_p13 = scmp.ne.s32.totalorder %s835_s22, 0 }
  0x5d   : > { %s595_s12 = smov [#allocation7]  }
  0x5e   : > { %p505_p11 = pnand %p504_p8, %p842_p13  ;;  %s507_s7 = sshll.u32 %s595_s12, 4  ;;  %s508_s7 = int_to_ptr.vmem [resolvable:$false] %s507_s7 }
  0x5f   : > { %s509_s8 = scalar_lea.vmem %s508_s7, 512  ;;  %p510_p6 = scmp.lt.s32.totalorder %s775_s30, %s508_s7 }
  0x60   : > { %p506_p4 = pneg %p505_p11  ;;  %p511_p7 = scmp.lt.s32.totalorder %s509_s8, %s503_s25 }
  0x62   : > { %p512_p0 = por %p511_p7, %p510_p6 }
  0x64   : > { %p513_p9 = pnand %p512_p0, %p506_p4 }
  0x66   : > { %516 = shalt.err (!%p513_p9)
}
  0x67   : > { %s517_s16 = scalar_lea.hbm %s780_s3, 256  ;;  %s521_s6 = scalar_lea.hbm %s830_s2, 2048 }
  0x68   : > { %p518_p5 = scmp.ne.s32.totalorder %s780_s3, %s517_s16  ;;  %p522_p3 = scmp.lt.u32.totalorder %s780_s3, %s830_s2 }
  0x69   : > { %p523_p12 = scmp.lt.u32.totalorder %s521_s6, %s517_s16  ;;  %p525_p8 = scmp.lt.u32.totalorder %s517_s16, %s780_s3 }
  0x6a   : > { %p519_p10 = pnand %p518_p5, %p842_p13 }
  0x6b   : > { %p524_p2 = por %p523_p12, %p522_p3 }
  0x6c   : > { %p520_p1 = pneg %p519_p10 }
  0x6d   : > { %p526_p11 = por %p525_p8, %p524_p2 }
  0x6f   : > { %p527_p4 = pnand %p526_p11, %p520_p1 }
  0x71   : > { %530 = shalt.err (!%p527_p4)
}
  0x72   : > { %s596_s19 = smov 128   ;;  %s597_s26 = smov 8  }
  0x73   : > { %376 = dma.vmem_to_hbm [thread:$0]  (%p842_p13), %s775_s30, 256, %s780_s3, %s228_s21, %s596_s19, %s596_s19, %s597_s26  }
  0x74 PF: > { %p390_p6 = scmp.ge.s32.totalorder %s589_s14, 2  ;;  %s257_s27 = sand.u32 1, %s569_s9  }
  0x75   : > { %p843_p7 = scmp.ne.s32.totalorder %s836_s24, 0  ;;  %s258_s28 = scalar_lea.sflag [#allocation4], %s257_s27 }
  0x77   : > { %p386_p0 = pnand %p390_p6, %p843_p7 }
  0x79   : > { %564 = dma.done.wait (!%p386_p0), %s258_s28, 256  }
  0x7a   : > { %566 = vsyncadd (!%p386_p0), %s258_s28, 4294967040  ;;  %s21_s14 = sadd.s32 1, %s589_s14   ;;  %s844_s9 = smov %s573_s10 }
  0x7b   : > { %p18_p9 = scmp.ge.s32.totalorder %s21_s14, 10   ;;  %s845_s10 = smov %s577_s11 }
  0x7c   : > { %s846_s11 = smov %s669_s23  ;;  %s847_s12 = smov %s585_s13 }
  0x7d   : > { %s848_s13 = smov %s850_s17  ;;  %20 = sbr.rel (!%p18_p9) target bundleno = 8 (0x8), region = 87 }
  0x84   :  { %263 = vsyncpa [#allocation3], 1 }
  0x85   :  { %265 = vsyncpa [#allocation3 + $0x1], 1 }
  0x86   :  { %266 = vsyncpa [#allocation6], 1 }
  0x87   :  { %268 = vsyncpa [#allocation6 + $0x1], 1 }
  0x88   :  { %269 = vsyncpa [#allocation4], 1 }
  0x89   :  { %271 = vsyncpa [#allocation4 + $0x1], 1 }

</bundles_post_ra>
